<compile_context>
chip_gen: v6e
topology: v6e:2x2x1
jax: 0.10.0
libtpu: 0.0.40
codegen_flags: <defaults>
</compile_context>

<pallas_src>
import functools
import math

import jax
import jax.numpy as jnp
from jax.experimental import pallas as pl
from jax.experimental.pallas import tpu as pltpu


def _rmsnorm_kernel(x_ref, w_ref, o_ref, *, eps: float, inv_dim: float):
    # x_ref: (tile_rows, dim), w_ref: (1, dim) f32, o_ref: (tile_rows, dim)
    x = x_ref[...].astype(jnp.float32)
    # Sum of squares over the lane axis (XLU), then scale by 1/dim on the
    # already-reduced (tr, 1) column instead of a full-width mean divide.
    ss = jnp.sum(x * x, axis=-1, keepdims=True)
    inv_rms = jax.lax.rsqrt(ss * inv_dim + eps)          # EUP rsqrt
    o_ref[...] = (x * inv_rms * w_ref[...]).astype(o_ref.dtype)


def _round_up(x: int, m: int) -> int:
    return ((x + m - 1) // m) * m


def _sublane_multiple(dtype) -> int:
    """Sublane packing granularity: 8 for 32-bit, 16 for 16-bit, 32 for 8-bit."""
    bits = jnp.dtype(dtype).itemsize * 8
    return max(8, 256 // bits)


def _vmem_capacity_bytes() -> int:
    try:
        return int(pltpu.get_tpu_info().vmem_capacity_bytes)
    except Exception:
        # Conservative fallback (v7x per-TC VMEM).
        return 64 * 1024 * 1024


def _tile_plan(rows: int, dim: int, dtype, requested) -> tuple[int, int]:
    """Pick (tile_rows, vmem_limit_bytes) from one shared VMEM model."""
    sub = _sublane_multiple(dtype)
    itemsize = jnp.dtype(dtype).itemsize
    vmem_cap = _vmem_capacity_bytes()
    dim_lanes = _round_up(dim, 128)  # lane-axis padding

    # Shared VMEM model, bytes per tile row:
    #   input + output tiles, double-buffered by the pipeline -> 4 * itemsize
    #   f32 temporaries: ~4 B/elem (single-buffered) for sub-32-bit inputs;
    #   for f32 inputs the astype is a no-op, temps live in vregs -> ~0 extra.
    f32_temp = 0 if itemsize >= 4 else 4
    per_row = dim_lanes * (4 * itemsize + f32_temp)

    if requested is not None:
        tr = max(sub, (int(requested) // sub) * sub)
    else:
        # ~40% of physical VMEM for the pipelined tiles + temps; the rest is
        # headroom for the resident f32 weight block and compiler scratch.
        budget = (vmem_cap * 2) // 5
        tr = min(4096, max(sub, budget // per_row))
        tr = max(sub, (tr // sub) * sub)

        # Rebalance: split rows evenly over the implied step count so the
        # last (masked) block isn't mostly wasted, and prefer a few grid
        # steps (DMA double-buffering; both v7x TensorCores stream) as long
        # as each tile still moves >= ~1 MiB of input.
        max_steps_by_rows = pl.cdiv(rows, sub)
        rows_for_1mb = max(sub, (1 << 20) // (dim_lanes * itemsize))
        max_steps_by_bytes = max(1, rows // rows_for_1mb)
        desired_steps = max(1, min(4, max_steps_by_rows, max_steps_by_bytes))
        steps = max(desired_steps, pl.cdiv(rows, tr))
        tr = max(sub, min(tr, _round_up(pl.cdiv(rows, steps), sub)))

    # VMEM limit derived from the same model (plus the f32 weight block and
    # a little compiler scratch headroom), capped below physical VMEM.
    weight_bytes = 2 * dim_lanes * 4
    tile_vmem = tr * per_row + weight_bytes
    vmem_limit = int(min(int(vmem_cap * 0.9),
                         max(32 << 20, tile_vmem + (2 << 20))))
    return tr, vmem_limit


def rmsnorm(x: jax.Array, weight: jax.Array, eps: float = 1e-6,
            tile_rows: int | None = None) -> jax.Array:
    """RMSNorm over the last dim of x. x: [..., dim], weight: [dim]."""
    orig_shape = x.shape
    dim = orig_shape[-1]
    rows = math.prod(orig_shape[:-1]) if len(orig_shape) > 1 else 1

    x2d = x.reshape(rows, dim)
    # Hoist the weight cast out of the kernel; the (1, dim) block with a
    # constant index_map stays VMEM-resident across all grid steps.
    w2d = weight.reshape(1, dim).astype(jnp.float32)

    tr, vmem_limit = _tile_plan(rows, dim, x.dtype, tile_rows)
    grid = (pl.cdiv(rows, tr),)  # last block (if partial) is masked: the
    # garbage rows it computes are never stored, so no pad/slice HBM passes.

    # TODO(synk): for very small hidden dims (< 128 lanes) the output stores
    # are masked (vst.msk); packing k=128//dim rows per lane row with a
    # segmented in-kernel reduce would give ~k x on those shapes, but
    # realistic LLM hidden sizes are already lane-dense.
    out = pl.pallas_call(
        functools.partial(_rmsnorm_kernel, eps=float(eps), inv_dim=1.0 / dim),
        out_shape=jax.ShapeDtypeStruct((rows, dim), x.dtype),
        grid_spec=pltpu.PrefetchScalarGridSpec(
            num_scalar_prefetch=0,
            grid=grid,
            in_specs=[
                pl.BlockSpec((tr, dim), lambda i: (i, 0)),   # x tile
                pl.BlockSpec((1, dim), lambda i: (0, 0)),    # weight (resident)
            ],
            out_specs=pl.BlockSpec((tr, dim), lambda i: (i, 0)),
        ),
        compiler_params=pltpu.CompilerParams(
            dimension_semantics=("parallel",),
            vmem_limit_bytes=vmem_limit),
    )(x2d, w2d)

    return out.reshape(orig_shape)


def _reference(x, weight, eps):
    rms = jax.lax.rsqrt(jnp.mean(
        x.astype(jnp.float32) ** 2, axis=-1, keepdims=True) + eps)
    return (x.astype(jnp.float32) * rms * weight.astype(jnp.float32)
            ).astype(x.dtype)


if __name__ == "__main__":
    key = jax.random.PRNGKey(0)

    # Case 1: shapes implied by the module (batch=2, seq=8, hidden=32).
    batch, seq, hidden = 2, 8, 32
    x = jax.random.normal(key, (batch, seq, hidden), dtype=jnp.float32)
    weight = jnp.ones((hidden,), dtype=jnp.float32)  # RMSNorm init: ones(dim)

    y = jax.block_until_ready(rmsnorm(x, weight, eps=1e-6))
    y_ref = _reference(x, weight, 1e-6)
    assert jnp.allclose(y, y_ref, atol=1e-5, rtol=1e-5), "mismatch vs reference"

    # Case 2: row count not a multiple of the tile -> exercises the masked
    # last-block path (no pad / slice passes anymore).
    k2 = jax.random.PRNGKey(1)
    x2 = jax.random.normal(k2, (3, 5, hidden), dtype=jnp.float32)  # 15 rows
    y2 = jax.block_until_ready(rmsnorm(x2, weight, eps=1e-6))
    y2_ref = _reference(x2, weight, 1e-6)
    assert jnp.allclose(y2, y2_ref, atol=1e-5, rtol=1e-5), "masked-path mismatch"

    print("KERNEL_OK")
</pallas_src>

<mosaic_0001>
module attributes {stable_mosaic.version = 11 : i64} {
  func.func @_rmsnorm_kernel(%arg0: i32, %arg1: memref<16x32xf32, #tpu.memory_space<vmem>>, %arg2: memref<1x32xf32, #tpu.memory_space<vmem>>, %arg3: memref<16x32xf32, #tpu.memory_space<vmem>>) attributes {dimension_semantics = [#tpu.dimension_semantics<parallel>], iteration_bounds = array<i64: 1>, scalar_prefetch = 0 : i64, scratch_operands = 0 : i64, tpu.core_type = #tpu.core_type<tc>, window_params = [{transform_indices = @transform_0, window_bounds = array<i64: 16, 32>}, {pipeline_mode = #tpu.pipeline_mode<synchronous>, transform_indices = @transform_1, window_bounds = array<i64: 1, 32>}, {transform_indices = @transform_2, window_bounds = array<i64: 16, 32>}]} {
    %c0 = arith.constant 0 : index
    %c0_0 = arith.constant 0 : index
    %0 = vector.load %arg1[%c0, %c0_0] : memref<16x32xf32, #tpu.memory_space<vmem>>, vector<16x32xf32>
    %1 = arith.mulf %0, %0 : vector<16x32xf32>
    %cst = arith.constant dense<0.000000e+00> : vector<16xf32>
    %2 = vector.multi_reduction <add>, %1, %cst [1] : vector<16x32xf32> to vector<16xf32>
    %3 = vector.shape_cast %2 : vector<16xf32> to vector<16x1xf32>
    %cst_1 = arith.constant 3.125000e-02 : f32
    %4 = vector.broadcast %cst_1 : f32 to vector<16x1xf32>
    %5 = arith.mulf %3, %4 : vector<16x1xf32>
    %cst_2 = arith.constant 9.99999997E-7 : f32
    %6 = vector.broadcast %cst_2 : f32 to vector<16x1xf32>
    %7 = arith.addf %5, %6 : vector<16x1xf32>
    %8 = math.rsqrt %7 : vector<16x1xf32>
    %9 = vector.broadcast %8 : vector<16x1xf32> to vector<16x32xf32>
    %10 = arith.mulf %0, %9 : vector<16x32xf32>
    %c0_3 = arith.constant 0 : index
    %c0_4 = arith.constant 0 : index
    %11 = vector.load %arg2[%c0_3, %c0_4] : memref<1x32xf32, #tpu.memory_space<vmem>>, vector<1x32xf32>
    %12 = vector.broadcast %11 : vector<1x32xf32> to vector<16x32xf32>
    %13 = arith.mulf %10, %12 : vector<16x32xf32>
    %c0_5 = arith.constant 0 : index
    %c0_6 = arith.constant 0 : index
    %14 = vector.load %arg3[%c0_5, %c0_6] : memref<16x32xf32, #tpu.memory_space<vmem>>, vector<16x32xf32>
    tpu.vector_store %arg3[%c0_5, %c0_6], %13 {strides = array<i32>} : memref<16x32xf32, #tpu.memory_space<vmem>>, vector<16x32xf32>,
    return
  }
  func.func @transform_0(%arg0: i32) -> (i32, i32) {
    %c0_i32 = arith.constant 0 : i32
    %c0_i32_0 = arith.constant 0 : i32
    return %arg0, %c0_i32 : i32, i32
  }
  func.func @transform_1(%arg0: i32) -> (i32, i32) {
    %c0_i32 = arith.constant 0 : i32
    %c0_i32_0 = arith.constant 0 : i32
    %c0_i32_1 = arith.constant 0 : i32
    return %c0_i32, %c0_i32_0 : i32, i32
  }
  func.func @transform_2(%arg0: i32) -> (i32, i32) {
    %c0_i32 = arith.constant 0 : i32
    %c0_i32_0 = arith.constant 0 : i32
    return %arg0, %c0_i32 : i32, i32
  }
}

</mosaic_0001>

<bundles_post_ra>
// kernel: tpu_custom_call.1
= control target key start
LH: loop header
LB: loop body
LE: loop exit
PB: predicated region body
PF: predicated region fallthrough
CT: control target
= control target key end

     0   :  { %7 = vsyncpa [#allocation3], 0  ;;  %s164_s0 = inlined_call_operand.hbm [shape: f32[16,32], index: 0, kind: input, shape index: {}]   ;;  %s165_s1 = inlined_call_operand.vmem [shape: f32[1,32], index: 1, kind: input, shape index: {}]   ;;  %s166_s2 = inlined_call_operand.hbm [shape: f32[16,32], index: 2, kind: output, shape index: {}]  }
   0x1   :  { %8 = vsyncpa [#allocation4], 0  ;;  %s126_s9 = smov [#allocation2]  }
   0x2   :  { %s14_s10 = sshll.u32 %s126_s9, 4  ;;  %s15_s10 = int_to_ptr.vmem [resolvable:$true] %s14_s10 }
   0x3   :  { %s90_s11 = scalar_lea.vmem %s15_s10, 256  ;;  %p95_p1 = scmp.lt.s32.totalorder %s15_s10, %s15_s10 }
   0x4   :  { %p91_p0 = scmp.ne.s32.totalorder %s15_s10, %s90_s11  ;;  %p96_p2 = scmp.lt.s32.totalorder %s90_s11, %s90_s11 }
   0x6   :  { %p97_p3 = por %p96_p2, %p95_p1 }
   0x8   :  { %p98_p4 = pnand %p97_p3, %p91_p0 }
   0xa   :  { %101 = shalt.err (!%p98_p4)
}
   0xb   :  { %s127_s12 = smov 128   ;;  %s128_s13 = smov 8  }
   0xc   :  { %20 = dma.hbm_to_vmem [thread:$0]  %s164_s0, 256, %s15_s10, [#allocation3], %s127_s12, %s127_s12, %s128_s13  }
   0xd   :  { %122 = dma.done.wait [#allocation3], 256  }
   0xe   :  { %123 = vsyncadd [#allocation3], 4294967040  ;;  %v26_v0 = vld [vmem:[#allocation2] sm:$0xff]  ;;  %vm30_vm0 = vcmask 261120   ;;  %v27_v1 = vld [vmem:[#allocation2 + $0x8] sm:$0xff]  ;;  %s129_s17 = smov [#allocation5]  }
   0xf   :  { %v28_v2 = vmul.f32 %v26_v0, %v26_v0  ;;  %v29_v3 = vmul.f32 %v27_v1, %v27_v1  ;;  %v73_v13 = vld [vmem:[%s165_s1] ss:$0 sm:$0xff]  ;;  %s61_s18 = sshll.u32 %s129_s17, 4  ;;  %s62_s18 = int_to_ptr.vmem [resolvable:$true] %s61_s18 }
  0x10   :  { %s102_s19 = scalar_lea.vmem %s62_s18, 256  ;;  %p107_p6 = scmp.lt.s32.totalorder %s62_s18, %s62_s18 }
  0x11   :  { %v31_v4 = vsel %vm30_vm0, %v28_v2, 0.0  ;;  %v34_v5 = vsel %vm30_vm0, %v29_v3, 0.0  ;;  %p103_p5 = scmp.ne.s32.totalorder %s62_s18, %s102_s19  ;;  %p108_p7 = scmp.lt.s32.totalorder %s102_s19, %s102_s19 }
  0x12   :  { %32 = vadd.xlane.f32.xlu0 %v31_v4 }
  0x13   :  { %p109_p8 = por %p108_p7, %p107_p6 }
  0x15   :  { %p110_p9 = pnand %p109_p8, %p103_p5 }
  0x16   :  { %35 = vadd.xlane.f32.xlu0 %v34_v5 }
  0x9b   :  { %v33_v6 = vpop.xlane.xlu0 %32 }
  0x9c   :  { %v37_v7 = vmul.f32 0.03125, %v33_v6 }
  0x9e   :  { %v39_v8 = vadd.f32 1e-06, %v37_v7 }
  0x9f   :  { %v36_v9 = vpop.xlane.xlu0 %35 }
  0xa0   :  { %78 = vrsqrt.f32 %v39_v8  ;;  %v38_v10 = vmul.f32 0.03125, %v36_v9 }
  0xa2   :  { %v40_v11 = vadd.f32 1e-06, %v38_v10 }
  0xa4   :  { %80 = vrsqrt.f32 %v40_v11 }
  0xad   :  { %v79_v12 = vpop.eup %78 }
  0xae   :  { %v43_v14 = vmul.f32 %v79_v12, %v26_v0 }
  0xb0   :  { %v52_v15 = vmul.f32 %v73_v13, %v43_v14 }
  0xb1   :  { %v81_v16 = vpop.eup %80 }
  0xb2   :  { %v44_v17 = vmul.f32 %v81_v16, %v27_v1  ;;  %54 = vst.msk [vmem:[#allocation5] sm:$0xff] %vm30_vm0, %v52_v15 }
  0xb4   :  { %v53_v18 = vmul.f32 %v73_v13, %v44_v17 }
  0xb6   :  { %55 = vst.msk [vmem:[#allocation5 + $0x8] sm:$0xff] %vm30_vm0, %v53_v18 }
  0xb7   :  { %113 = shalt.err (!%p110_p9)
}
  0xb8   :  { %67 = dma.vmem_to_hbm [thread:$0]  %s62_s18, 256, %s166_s2, [#allocation4], %s127_s12, %s127_s12, %s128_s13  }
  0xb9   :  { %124 = dma.done.wait [#allocation4], 256  }
  0xba   :  { %125 = vsyncadd [#allocation4], 4294967040 }
  0xbb   :  { %71 = vsyncpa [#allocation3], 1 }
  0xbc   :  { %72 = vsyncpa [#allocation4], 1 }

</bundles_post_ra>
